<compile_context>
chip_gen: v6e
topology: v6e:2x2x1
jax: 0.10.0
libtpu: 0.0.40
codegen_flags: <defaults>
</compile_context>

<pallas_src>
import math
import functools

import jax
import jax.numpy as jnp
from jax.experimental import pallas as pl
from jax.experimental.pallas import tpu as pltpu


def _vit_attn_kernel(x_ref, wqkv_ref, wp_ref, o_ref, *,
                     n_head, h_size, block_b, n_tokens, n_valid):
    Bt, N, H, hs = block_b, n_tokens, n_head, h_size
    D = H * hs

    x2d = x_ref[...].reshape(Bt * N, D)                       # (M, D) bf16, M = Bt*N

    # q/k/v projections as three full-lane-width (M,D)x(D,D) GEMMs; f32 accumulate,
    # immediate bf16 cast -> no (M, 3D) f32 temp.  The softmax scale 1/sqrt(hs) is
    # already folded into wqkv[0] by prepare_vit_attention_weights.
    q = jnp.dot(x2d, wqkv_ref[0], preferred_element_type=jnp.float32).astype(jnp.bfloat16)
    k = jnp.dot(x2d, wqkv_ref[1], preferred_element_type=jnp.float32).astype(jnp.bfloat16)
    v = jnp.dot(x2d, wqkv_ref[2], preferred_element_type=jnp.float32).astype(jnp.bfloat16)

    q3 = q.reshape(Bt, N, D)
    k3 = k.reshape(Bt, N, D)
    v3 = v.reshape(Bt, N, D)

    if n_valid < N:
        # Padded key columns get a large negative score so they vanish in softmax.
        key_col = jax.lax.broadcasted_iota(jnp.int32, (1, 1, N), 2)
        key_live = key_col < n_valid
    else:
        key_live = None

    acc = jnp.zeros((Bt * N, D), jnp.float32)
    # n_head is small and static -> unrolled Python loop over heads; everything
    # inside is batched over the Bt images of the current grid step.
    for h in range(H):
        lo, hi = h * hs, (h + 1) * hs
        qh = q3[:, :, lo:hi]                                   # (Bt, N, hs) bf16
        kh = k3[:, :, lo:hi]
        vh = v3[:, :, lo:hi]

        # Batched scores; contraction on the head dim of both operands (no kh.T).
        s = jnp.einsum('bnd,bmd->bnm', qh, kh,
                       preferred_element_type=jnp.float32)     # (Bt, N, N) f32
        if key_live is not None:
            s = jnp.where(key_live, s, jnp.float32(-1e30))

        s = s - jnp.max(s, axis=-1, keepdims=True)
        p = jnp.exp(s)                                         # f32, unnormalized
        denom = jnp.sum(p, axis=-1, keepdims=True)             # (Bt, N, 1) f32

        # Unnormalized PV matmul; normalization deferred to the (Bt, N, hs) result.
        y = jnp.einsum('bnm,bmd->bnd', p.astype(jnp.bfloat16), vh,
                       preferred_element_type=jnp.float32)     # (Bt, N, hs) f32
        y = y * pl.reciprocal(denom, approx=True)              # EUP slot, broadcast over hs

        # Output projection accumulated per head; wp_ref[h] = W_proj^T rows [h*hs:(h+1)*hs]
        # selected by leading-dim ref indexing (no lane-dim concat of head outputs).
        acc = acc + jnp.dot(y.reshape(Bt * N, hs).astype(jnp.bfloat16), wp_ref[h],
                            preferred_element_type=jnp.float32)

    o_ref[...] = acc.reshape(Bt, N, D).astype(o_ref.dtype)


@functools.lru_cache(maxsize=None)
def _hw_params():
    """Generation-aware VMEM / tiling budget (trace-time query, safe fallbacks)."""
    kind = ""
    try:
        kind = jax.devices()[0].device_kind.lower()
    except Exception:
        pass
    is_v7 = ("v7" in kind) or ("7x" in kind)

    vmem_cap = None
    try:
        vmem_cap = int(pltpu.get_tpu_info().vmem_capacity_bytes)
    except Exception:
        vmem_cap = None
    if vmem_cap is None:
        if is_v7:
            vmem_cap = 64 << 20          # v7x: 64 MiB / TensorCore
        elif kind:
            vmem_cap = 128 << 20         # v5e / v6e: 128 MiB
        else:
            vmem_cap = 64 << 20          # unknown: be conservative

    small_vmem = vmem_cap <= (64 << 20)
    return dict(
        vmem_limit_bytes=int(min((vmem_cap * 3) // 4, 100 << 20)),  # 48 MiB v7x, 96 MiB v5e/v6e
        target_rows=256 if small_vmem else 512,   # GEMM M target (multiple of MXU rows)
        max_rows=1024 if small_vmem else 2048,
        min_grid=2 if is_v7 else 1,               # v7x: 2 TCs -> want a parallel grid >= 2
    )


def _pick_block_b(B, rows_per_image, *, target_rows, max_rows, min_grid):
    """Pick a batch tile so the GEMM M dim (block_b * N) approaches the target,
    while keeping the grid long enough for megacore sharding on 2-TC parts."""
    divisors = [d for d in range(1, B + 1) if B % d == 0]
    fitting = [d for d in divisors if d * rows_per_image <= max_rows] or [1]
    bt = fitting[-1]
    for d in fitting:
        if d * rows_per_image >= target_rows:
            bt = d
            break
    while B // bt < min_grid and bt > 1:
        smaller = [d for d in fitting if d < bt]
        if not smaller:
            break
        bt = smaller[-1]
    return bt


def prepare_vit_attention_weights(w_attn, w_proj, *, n_head, h_size,
                                  compute_dtype=jnp.bfloat16):
    """One-time weight preparation (do this once in model state, not per forward).

    w_attn: (3D, D) PyTorch nn.Linear weight of c_attn
    w_proj: (D, D)  PyTorch nn.Linear weight of c_proj
    Returns:
      wqkv: (3, D, D)  = [W_q^T * 1/sqrt(h_size), W_k^T, W_v^T]   (compute_dtype)
      wp:   (n_head, h_size, D) per-head row blocks of W_proj^T    (compute_dtype)
    """
    D = n_head * h_size
    w_attn = jnp.asarray(w_attn)
    w_proj = jnp.asarray(w_proj)
    assert w_attn.shape == (3 * D, D)
    assert w_proj.shape == (D, D)

    scale = 1.0 / math.sqrt(h_size)
    wqkv = jnp.swapaxes(w_attn.reshape(3, D, D), 1, 2)        # (3, D_in, D_out) = W^T blocks
    wqkv = wqkv.at[0].multiply(scale).astype(compute_dtype)   # fold softmax scale into W_q^T

    wp = jnp.swapaxes(w_proj, 0, 1)                            # (D_in, D_out) = W_proj^T
    wp = wp.reshape(n_head, h_size, D).astype(compute_dtype)   # per-head row blocks
    return wqkv, wp


def vit_self_attention(x, wqkv, wp, *, n_head, h_size, block_b=None,
                       out_dtype=None, compute_dtype=jnp.bfloat16):
    """Forward pass of ViTSelfAttention (d_rate = 0).

    x:    (B, N, D)
    wqkv: (3, D, D)            from prepare_vit_attention_weights
    wp:   (n_head, h_size, D)  from prepare_vit_attention_weights
    """
    B, N, D = x.shape
    assert n_head * h_size == D
    assert wqkv.shape == (3, D, D)
    assert wp.shape == (n_head, h_size, D)
    if out_dtype is None:
        out_dtype = compute_dtype   # bf16 out: halves writeback DMA / output VMEM

    # Pad tokens to a multiple of 8 so in-kernel reshapes/GEMMs stay sublane-aligned
    # (real ViT token counts like 197 are ragged); padded keys are masked in-kernel.
    n_valid = N
    n_pad = (-N) % 8
    x_c = x.astype(compute_dtype)
    if n_pad:
        x_c = jnp.pad(x_c, ((0, 0), (0, n_pad), (0, 0)))
    N_k = N + n_pad

    hw = _hw_params()
    if block_b is None:
        block_b = _pick_block_b(B, N_k, target_rows=hw["target_rows"],
                                max_rows=hw["max_rows"], min_grid=hw["min_grid"])
    assert B % block_b == 0

    wqkv_c = wqkv.astype(compute_dtype)   # no-ops when already prepared in bf16
    wp_c = wp.astype(compute_dtype)

    kernel = functools.partial(_vit_attn_kernel, n_head=n_head, h_size=h_size,
                               block_b=block_b, n_tokens=N_k, n_valid=n_valid)

    out = pl.pallas_call(
        kernel,
        out_shape=jax.ShapeDtypeStruct((B, N_k, D), out_dtype),
        grid_spec=pltpu.PrefetchScalarGridSpec(
            num_scalar_prefetch=0,
            grid=(B // block_b,),
            in_specs=[
                pl.BlockSpec((block_b, N_k, D), lambda b: (b, 0, 0)),    # x batch tile
                pl.BlockSpec((3, D, D), lambda b: (0, 0, 0)),            # W_{q,k,v}^T (replicated)
                pl.BlockSpec((n_head, h_size, D), lambda b: (0, 0, 0)),  # W_proj^T per head
            ],
            out_specs=pl.BlockSpec((block_b, N_k, D), lambda b: (b, 0, 0)),
        ),
        compiler_params=pltpu.CompilerParams(
            dimension_semantics=("parallel",),
            vmem_limit_bytes=hw["vmem_limit_bytes"],
        ),
    )(x_c, wqkv_c, wp_c)

    if n_pad:
        out = out[:, :N, :]
    return out


def _reference(x, w_attn, w_proj, *, n_head, h_size):
    """Pure-JAX f32 reference mirroring the PyTorch forward (d_rate = 0)."""
    B, N, D = x.shape
    qkv = x @ w_attn.T                                     # (B, N, 3D)
    q, k, v = jnp.split(qkv, 3, axis=-1)

    def to_heads(t):
        return t.reshape(B, N, n_head, h_size).transpose(0, 2, 1, 3)  # (B, H, N, hs)

    q, k, v = to_heads(q), to_heads(k), to_heads(v)
    s = (q @ jnp.swapaxes(k, -2, -1)) / math.sqrt(h_size)  # (B, H, N, N)
    p = jax.nn.softmax(s, axis=-1)
    y = p @ v                                              # (B, H, N, hs)
    y = y.transpose(0, 2, 1, 3).reshape(B, N, D)
    return y @ w_proj.T


if __name__ == "__main__":
    # Small, module-consistent shapes: n_patch=8, n_embd=32, h_size=8 -> n_head=4.
    B, N, D = 2, 8, 32
    H_SIZE = 8
    N_HEAD = D // H_SIZE

    key = jax.random.PRNGKey(0)
    kx, ka, kp, kx2 = jax.random.split(key, 4)

    x = jax.random.normal(kx, (B, N, D), dtype=jnp.float32)

    # Deterministic Linear-style init (uniform +-1/sqrt(fan_in)), bias=False.
    bound = 1.0 / math.sqrt(D)
    w_attn = jax.random.uniform(ka, (3 * D, D), jnp.float32, -bound, bound)
    w_proj = jax.random.uniform(kp, (D, D), jnp.float32, -bound, bound)

    # One-time weight preparation (transpose, scale fold, bf16, per-head split).
    wqkv, wp = prepare_vit_attention_weights(w_attn, w_proj, n_head=N_HEAD, h_size=H_SIZE)

    fwd = jax.jit(functools.partial(vit_self_attention, n_head=N_HEAD, h_size=H_SIZE))
    out = jax.block_until_ready(fwd(x, wqkv, wp))

    ref = _reference(x, w_attn, w_proj, n_head=N_HEAD, h_size=H_SIZE)
    assert out.shape == (B, N, D)
    # bf16 matmul inputs / bf16 output + approx reciprocal vs f32 reference.
    assert jnp.allclose(out.astype(jnp.float32), ref, atol=5e-2, rtol=5e-2), \
        "mismatch vs reference"

    # Second check: a ragged token count (N=6) exercises the wrapper padding and the
    # in-kernel padded-key softmax mask.
    N2 = 6
    x2 = jax.random.normal(kx2, (B, N2, D), dtype=jnp.float32)
    out2 = jax.block_until_ready(fwd(x2, wqkv, wp))
    ref2 = _reference(x2, w_attn, w_proj, n_head=N_HEAD, h_size=H_SIZE)
    assert out2.shape == (B, N2, D)
    assert jnp.allclose(out2.astype(jnp.float32), ref2, atol=5e-2, rtol=5e-2), \
        "mismatch vs reference (padded N)"

    print("KERNEL_OK")
</pallas_src>

<mosaic_0001>
module attributes {stable_mosaic.version = 11 : i64} {
  func.func @_vit_attn_kernel(%arg0: i32, %arg1: memref<2x8x32xbf16, #tpu.memory_space<vmem>>, %arg2: memref<3x32x32xbf16, #tpu.memory_space<vmem>>, %arg3: memref<4x8x32xbf16, #tpu.memory_space<vmem>>, %arg4: memref<2x8x32xbf16, #tpu.memory_space<vmem>>) attributes {dimension_semantics = [#tpu.dimension_semantics<parallel>], iteration_bounds = array<i64: 1>, scalar_prefetch = 0 : i64, scratch_operands = 0 : i64, tpu.core_type = #tpu.core_type<tc>, window_params = [{transform_indices = @transform_0, window_bounds = array<i64: 2, 8, 32>}, {pipeline_mode = #tpu.pipeline_mode<synchronous>, transform_indices = @transform_1, window_bounds = array<i64: 3, 32, 32>}, {pipeline_mode = #tpu.pipeline_mode<synchronous>, transform_indices = @transform_2, window_bounds = array<i64: 4, 8, 32>}, {transform_indices = @transform_3, window_bounds = array<i64: 2, 8, 32>}]} {
    %c0 = arith.constant 0 : index
    %c0_0 = arith.constant 0 : index
    %c0_1 = arith.constant 0 : index
    %0 = vector.load %arg1[%c0, %c0_0, %c0_1] : memref<2x8x32xbf16, #tpu.memory_space<vmem>>, vector<2x8x32xbf16>
    %1 = vector.shape_cast %0 : vector<2x8x32xbf16> to vector<16x32xbf16>
    %c0_2 = arith.constant 0 : index
    %c0_3 = arith.constant 0 : index
    %c0_4 = arith.constant 0 : index
    %2 = vector.load %arg2[%c0_2, %c0_3, %c0_4] : memref<3x32x32xbf16, #tpu.memory_space<vmem>>, vector<1x32x32xbf16>
    %3 = vector.shape_cast %2 : vector<1x32x32xbf16> to vector<32x32xbf16>
    %cst = arith.constant dense<0.000000e+00> : vector<16x32xf32>
    %4 = tpu.matmul %1, %3, %cst {dimension_numbers = #tpu.dot_dimension_numbers<[1], [0], [0], [1], [0, 0, 1, 1], [], []>} : vector<16x32xbf16>, vector<32x32xbf16>, vector<16x32xf32> -> vector<16x32xf32>
    %5 = arith.truncf %4 : vector<16x32xf32> to vector<16x32xbf16>
    %c1 = arith.constant 1 : index
    %c0_5 = arith.constant 0 : index
    %c0_6 = arith.constant 0 : index
    %6 = vector.load %arg2[%c1, %c0_5, %c0_6] : memref<3x32x32xbf16, #tpu.memory_space<vmem>>, vector<1x32x32xbf16>
    %7 = vector.shape_cast %6 : vector<1x32x32xbf16> to vector<32x32xbf16>
    %cst_7 = arith.constant dense<0.000000e+00> : vector<16x32xf32>
    %8 = tpu.matmul %1, %7, %cst_7 {dimension_numbers = #tpu.dot_dimension_numbers<[1], [0], [0], [1], [0, 0, 1, 1], [], []>} : vector<16x32xbf16>, vector<32x32xbf16>, vector<16x32xf32> -> vector<16x32xf32>
    %9 = arith.truncf %8 : vector<16x32xf32> to vector<16x32xbf16>
    %c2 = arith.constant 2 : index
    %c0_8 = arith.constant 0 : index
    %c0_9 = arith.constant 0 : index
    %10 = vector.load %arg2[%c2, %c0_8, %c0_9] : memref<3x32x32xbf16, #tpu.memory_space<vmem>>, vector<1x32x32xbf16>
    %11 = vector.shape_cast %10 : vector<1x32x32xbf16> to vector<32x32xbf16>
    %cst_10 = arith.constant dense<0.000000e+00> : vector<16x32xf32>
    %12 = tpu.matmul %1, %11, %cst_10 {dimension_numbers = #tpu.dot_dimension_numbers<[1], [0], [0], [1], [0, 0, 1, 1], [], []>} : vector<16x32xbf16>, vector<32x32xbf16>, vector<16x32xf32> -> vector<16x32xf32>
    %13 = arith.truncf %12 : vector<16x32xf32> to vector<16x32xbf16>
    %14 = vector.shape_cast %5 : vector<16x32xbf16> to vector<2x8x32xbf16>
    %15 = vector.shape_cast %9 : vector<16x32xbf16> to vector<2x8x32xbf16>
    %16 = vector.shape_cast %13 : vector<16x32xbf16> to vector<2x8x32xbf16>
    %cst_11 = arith.constant 0.000000e+00 : f32
    %17 = vector.broadcast %cst_11 : f32 to vector<16x32xf32>
    %18 = vector.extract_strided_slice %14 {offsets = [0, 0, 0], sizes = [2, 8, 8], strides = [1, 1, 1]} : vector<2x8x32xbf16> to vector<2x8x8xbf16>
    %19 = vector.extract_strided_slice %15 {offsets = [0, 0, 0], sizes = [2, 8, 8], strides = [1, 1, 1]} : vector<2x8x32xbf16> to vector<2x8x8xbf16>
    %20 = vector.extract_strided_slice %16 {offsets = [0, 0, 0], sizes = [2, 8, 8], strides = [1, 1, 1]} : vector<2x8x32xbf16> to vector<2x8x8xbf16>
    "tpu.trace_start"() <{level = 10 : i32, message = "bnd,bmd->bnm"}> : () -> ()
    %cst_12 = arith.constant dense<0.000000e+00> : vector<2x8x8xf32>
    %21 = tpu.matmul %18, %19, %cst_12 {dimension_numbers = #tpu.dot_dimension_numbers<[2], [2], [1], [1], [0, 0, 0, 1, 1, 1], [0], [0]>} : vector<2x8x8xbf16>, vector<2x8x8xbf16>, vector<2x8x8xf32> -> vector<2x8x8xf32>
    "tpu.trace_stop"() : () -> ()
    %cst_13 = arith.constant dense<0xFF800000> : vector<2x8xf32>
    %22 = vector.multi_reduction <maximumf>, %21, %cst_13 [2] : vector<2x8x8xf32> to vector<2x8xf32>
    %23 = vector.shape_cast %22 : vector<2x8xf32> to vector<2x8x1xf32>
    %24 = vector.broadcast %23 : vector<2x8x1xf32> to vector<2x8x8xf32>
    %25 = arith.subf %21, %24 : vector<2x8x8xf32>
    %26 = math.exp %25 : vector<2x8x8xf32>
    %cst_14 = arith.constant dense<0.000000e+00> : vector<2x8xf32>
    %27 = vector.multi_reduction <add>, %26, %cst_14 [2] : vector<2x8x8xf32> to vector<2x8xf32>
    %28 = vector.shape_cast %27 : vector<2x8xf32> to vector<2x8x1xf32>
    %29 = arith.truncf %26 : vector<2x8x8xf32> to vector<2x8x8xbf16>
    "tpu.trace_start"() <{level = 10 : i32, message = "bnm,bmd->bnd"}> : () -> ()
    %cst_15 = arith.constant dense<0.000000e+00> : vector<2x8x8xf32>
    %30 = tpu.matmul %29, %20, %cst_15 {dimension_numbers = #tpu.dot_dimension_numbers<[2], [1], [1], [2], [0, 0, 0, 1, 1, 2], [0], [0]>} : vector<2x8x8xbf16>, vector<2x8x8xbf16>, vector<2x8x8xf32> -> vector<2x8x8xf32>
    "tpu.trace_stop"() : () -> ()
    %31 = tpu.reciprocal %28 {approx = true} : vector<2x8x1xf32> -> vector<2x8x1xf32>
    %32 = vector.broadcast %31 : vector<2x8x1xf32> to vector<2x8x8xf32>
    %33 = arith.mulf %30, %32 : vector<2x8x8xf32>
    %34 = vector.shape_cast %33 : vector<2x8x8xf32> to vector<16x8xf32>
    %35 = arith.truncf %34 : vector<16x8xf32> to vector<16x8xbf16>
    %c0_16 = arith.constant 0 : index
    %c0_17 = arith.constant 0 : index
    %c0_18 = arith.constant 0 : index
    %36 = vector.load %arg3[%c0_16, %c0_17, %c0_18] : memref<4x8x32xbf16, #tpu.memory_space<vmem>>, vector<1x8x32xbf16>
    %37 = vector.shape_cast %36 : vector<1x8x32xbf16> to vector<8x32xbf16>
    %cst_19 = arith.constant dense<0.000000e+00> : vector<16x32xf32>
    %38 = tpu.matmul %35, %37, %cst_19 {dimension_numbers = #tpu.dot_dimension_numbers<[1], [0], [0], [1], [0, 0, 1, 1], [], []>} : vector<16x8xbf16>, vector<8x32xbf16>, vector<16x32xf32> -> vector<16x32xf32>
    %39 = arith.addf %17, %38 : vector<16x32xf32>
    %40 = vector.extract_strided_slice %14 {offsets = [0, 0, 8], sizes = [2, 8, 8], strides = [1, 1, 1]} : vector<2x8x32xbf16> to vector<2x8x8xbf16>
    %41 = vector.extract_strided_slice %15 {offsets = [0, 0, 8], sizes = [2, 8, 8], strides = [1, 1, 1]} : vector<2x8x32xbf16> to vector<2x8x8xbf16>
    %42 = vector.extract_strided_slice %16 {offsets = [0, 0, 8], sizes = [2, 8, 8], strides = [1, 1, 1]} : vector<2x8x32xbf16> to vector<2x8x8xbf16>
    "tpu.trace_start"() <{level = 10 : i32, message = "bnd,bmd->bnm"}> : () -> ()
    %cst_20 = arith.constant dense<0.000000e+00> : vector<2x8x8xf32>
    %43 = tpu.matmul %40, %41, %cst_20 {dimension_numbers = #tpu.dot_dimension_numbers<[2], [2], [1], [1], [0, 0, 0, 1, 1, 1], [0], [0]>} : vector<2x8x8xbf16>, vector<2x8x8xbf16>, vector<2x8x8xf32> -> vector<2x8x8xf32>
    "tpu.trace_stop"() : () -> ()
    %cst_21 = arith.constant dense<0xFF800000> : vector<2x8xf32>
    %44 = vector.multi_reduction <maximumf>, %43, %cst_21 [2] : vector<2x8x8xf32> to vector<2x8xf32>
    %45 = vector.shape_cast %44 : vector<2x8xf32> to vector<2x8x1xf32>
    %46 = vector.broadcast %45 : vector<2x8x1xf32> to vector<2x8x8xf32>
    %47 = arith.subf %43, %46 : vector<2x8x8xf32>
    %48 = math.exp %47 : vector<2x8x8xf32>
    %cst_22 = arith.constant dense<0.000000e+00> : vector<2x8xf32>
    %49 = vector.multi_reduction <add>, %48, %cst_22 [2] : vector<2x8x8xf32> to vector<2x8xf32>
    %50 = vector.shape_cast %49 : vector<2x8xf32> to vector<2x8x1xf32>
    %51 = arith.truncf %48 : vector<2x8x8xf32> to vector<2x8x8xbf16>
    "tpu.trace_start"() <{level = 10 : i32, message = "bnm,bmd->bnd"}> : () -> ()
    %cst_23 = arith.constant dense<0.000000e+00> : vector<2x8x8xf32>
    %52 = tpu.matmul %51, %42, %cst_23 {dimension_numbers = #tpu.dot_dimension_numbers<[2], [1], [1], [2], [0, 0, 0, 1, 1, 2], [0], [0]>} : vector<2x8x8xbf16>, vector<2x8x8xbf16>, vector<2x8x8xf32> -> vector<2x8x8xf32>
    "tpu.trace_stop"() : () -> ()
    %53 = tpu.reciprocal %50 {approx = true} : vector<2x8x1xf32> -> vector<2x8x1xf32>
    %54 = vector.broadcast %53 : vector<2x8x1xf32> to vector<2x8x8xf32>
    %55 = arith.mulf %52, %54 : vector<2x8x8xf32>
    %56 = vector.shape_cast %55 : vector<2x8x8xf32> to vector<16x8xf32>
    %57 = arith.truncf %56 : vector<16x8xf32> to vector<16x8xbf16>
    %c1_24 = arith.constant 1 : index
    %c0_25 = arith.constant 0 : index
    %c0_26 = arith.constant 0 : index
    %58 = vector.load %arg3[%c1_24, %c0_25, %c0_26] : memref<4x8x32xbf16, #tpu.memory_space<vmem>>, vector<1x8x32xbf16>
    %59 = vector.shape_cast %58 : vector<1x8x32xbf16> to vector<8x32xbf16>
    %cst_27 = arith.constant dense<0.000000e+00> : vector<16x32xf32>
    %60 = tpu.matmul %57, %59, %cst_27 {dimension_numbers = #tpu.dot_dimension_numbers<[1], [0], [0], [1], [0, 0, 1, 1], [], []>} : vector<16x8xbf16>, vector<8x32xbf16>, vector<16x32xf32> -> vector<16x32xf32>
    %61 = arith.addf %39, %60 : vector<16x32xf32>
    %62 = vector.extract_strided_slice %14 {offsets = [0, 0, 16], sizes = [2, 8, 8], strides = [1, 1, 1]} : vector<2x8x32xbf16> to vector<2x8x8xbf16>
    %63 = vector.extract_strided_slice %15 {offsets = [0, 0, 16], sizes = [2, 8, 8], strides = [1, 1, 1]} : vector<2x8x32xbf16> to vector<2x8x8xbf16>
    %64 = vector.extract_strided_slice %16 {offsets = [0, 0, 16], sizes = [2, 8, 8], strides = [1, 1, 1]} : vector<2x8x32xbf16> to vector<2x8x8xbf16>
    "tpu.trace_start"() <{level = 10 : i32, message = "bnd,bmd->bnm"}> : () -> ()
    %cst_28 = arith.constant dense<0.000000e+00> : vector<2x8x8xf32>
    %65 = tpu.matmul %62, %63, %cst_28 {dimension_numbers = #tpu.dot_dimension_numbers<[2], [2], [1], [1], [0, 0, 0, 1, 1, 1], [0], [0]>} : vector<2x8x8xbf16>, vector<2x8x8xbf16>, vector<2x8x8xf32> -> vector<2x8x8xf32>
    "tpu.trace_stop"() : () -> ()
    %cst_29 = arith.constant dense<0xFF800000> : vector<2x8xf32>
    %66 = vector.multi_reduction <maximumf>, %65, %cst_29 [2] : vector<2x8x8xf32> to vector<2x8xf32>
    %67 = vector.shape_cast %66 : vector<2x8xf32> to vector<2x8x1xf32>
    %68 = vector.broadcast %67 : vector<2x8x1xf32> to vector<2x8x8xf32>
    %69 = arith.subf %65, %68 : vector<2x8x8xf32>
    %70 = math.exp %69 : vector<2x8x8xf32>
    %cst_30 = arith.constant dense<0.000000e+00> : vector<2x8xf32>
    %71 = vector.multi_reduction <add>, %70, %cst_30 [2] : vector<2x8x8xf32> to vector<2x8xf32>
    %72 = vector.shape_cast %71 : vector<2x8xf32> to vector<2x8x1xf32>
    %73 = arith.truncf %70 : vector<2x8x8xf32> to vector<2x8x8xbf16>
    "tpu.trace_start"() <{level = 10 : i32, message = "bnm,bmd->bnd"}> : () -> ()
    %cst_31 = arith.constant dense<0.000000e+00> : vector<2x8x8xf32>
    %74 = tpu.matmul %73, %64, %cst_31 {dimension_numbers = #tpu.dot_dimension_numbers<[2], [1], [1], [2], [0, 0, 0, 1, 1, 2], [0], [0]>} : vector<2x8x8xbf16>, vector<2x8x8xbf16>, vector<2x8x8xf32> -> vector<2x8x8xf32>
    "tpu.trace_stop"() : () -> ()
    %75 = tpu.reciprocal %72 {approx = true} : vector<2x8x1xf32> -> vector<2x8x1xf32>
    %76 = vector.broadcast %75 : vector<2x8x1xf32> to vector<2x8x8xf32>
    %77 = arith.mulf %74, %76 : vector<2x8x8xf32>
    %78 = vector.shape_cast %77 : vector<2x8x8xf32> to vector<16x8xf32>
    %79 = arith.truncf %78 : vector<16x8xf32> to vector<16x8xbf16>
    %c2_32 = arith.constant 2 : index
    %c0_33 = arith.constant 0 : index
    %c0_34 = arith.constant 0 : index
    %80 = vector.load %arg3[%c2_32, %c0_33, %c0_34] : memref<4x8x32xbf16, #tpu.memory_space<vmem>>, vector<1x8x32xbf16>
    %81 = vector.shape_cast %80 : vector<1x8x32xbf16> to vector<8x32xbf16>
    %cst_35 = arith.constant dense<0.000000e+00> : vector<16x32xf32>
    %82 = tpu.matmul %79, %81, %cst_35 {dimension_numbers = #tpu.dot_dimension_numbers<[1], [0], [0], [1], [0, 0, 1, 1], [], []>} : vector<16x8xbf16>, vector<8x32xbf16>, vector<16x32xf32> -> vector<16x32xf32>
    %83 = arith.addf %61, %82 : vector<16x32xf32>
    %84 = vector.extract_strided_slice %14 {offsets = [0, 0, 24], sizes = [2, 8, 8], strides = [1, 1, 1]} : vector<2x8x32xbf16> to vector<2x8x8xbf16>
    %85 = vector.extract_strided_slice %15 {offsets = [0, 0, 24], sizes = [2, 8, 8], strides = [1, 1, 1]} : vector<2x8x32xbf16> to vector<2x8x8xbf16>
    %86 = vector.extract_strided_slice %16 {offsets = [0, 0, 24], sizes = [2, 8, 8], strides = [1, 1, 1]} : vector<2x8x32xbf16> to vector<2x8x8xbf16>
    "tpu.trace_start"() <{level = 10 : i32, message = "bnd,bmd->bnm"}> : () -> ()
    %cst_36 = arith.constant dense<0.000000e+00> : vector<2x8x8xf32>
    %87 = tpu.matmul %84, %85, %cst_36 {dimension_numbers = #tpu.dot_dimension_numbers<[2], [2], [1], [1], [0, 0, 0, 1, 1, 1], [0], [0]>} : vector<2x8x8xbf16>, vector<2x8x8xbf16>, vector<2x8x8xf32> -> vector<2x8x8xf32>
    "tpu.trace_stop"() : () -> ()
    %cst_37 = arith.constant dense<0xFF800000> : vector<2x8xf32>
    %88 = vector.multi_reduction <maximumf>, %87, %cst_37 [2] : vector<2x8x8xf32> to vector<2x8xf32>
    %89 = vector.shape_cast %88 : vector<2x8xf32> to vector<2x8x1xf32>
    %90 = vector.broadcast %89 : vector<2x8x1xf32> to vector<2x8x8xf32>
    %91 = arith.subf %87, %90 : vector<2x8x8xf32>
    %92 = math.exp %91 : vector<2x8x8xf32>
    %cst_38 = arith.constant dense<0.000000e+00> : vector<2x8xf32>
    %93 = vector.multi_reduction <add>, %92, %cst_38 [2] : vector<2x8x8xf32> to vector<2x8xf32>
    %94 = vector.shape_cast %93 : vector<2x8xf32> to vector<2x8x1xf32>
    %95 = arith.truncf %92 : vector<2x8x8xf32> to vector<2x8x8xbf16>
    "tpu.trace_start"() <{level = 10 : i32, message = "bnm,bmd->bnd"}> : () -> ()
    %cst_39 = arith.constant dense<0.000000e+00> : vector<2x8x8xf32>
    %96 = tpu.matmul %95, %86, %cst_39 {dimension_numbers = #tpu.dot_dimension_numbers<[2], [1], [1], [2], [0, 0, 0, 1, 1, 2], [0], [0]>} : vector<2x8x8xbf16>, vector<2x8x8xbf16>, vector<2x8x8xf32> -> vector<2x8x8xf32>
    "tpu.trace_stop"() : () -> ()
    %97 = tpu.reciprocal %94 {approx = true} : vector<2x8x1xf32> -> vector<2x8x1xf32>
    %98 = vector.broadcast %97 : vector<2x8x1xf32> to vector<2x8x8xf32>
    %99 = arith.mulf %96, %98 : vector<2x8x8xf32>
    %100 = vector.shape_cast %99 : vector<2x8x8xf32> to vector<16x8xf32>
    %101 = arith.truncf %100 : vector<16x8xf32> to vector<16x8xbf16>
    %c3 = arith.constant 3 : index
    %c0_40 = arith.constant 0 : index
    %c0_41 = arith.constant 0 : index
    %102 = vector.load %arg3[%c3, %c0_40, %c0_41] : memref<4x8x32xbf16, #tpu.memory_space<vmem>>, vector<1x8x32xbf16>
    %103 = vector.shape_cast %102 : vector<1x8x32xbf16> to vector<8x32xbf16>
    %cst_42 = arith.constant dense<0.000000e+00> : vector<16x32xf32>
    %104 = tpu.matmul %101, %103, %cst_42 {dimension_numbers = #tpu.dot_dimension_numbers<[1], [0], [0], [1], [0, 0, 1, 1], [], []>} : vector<16x8xbf16>, vector<8x32xbf16>, vector<16x32xf32> -> vector<16x32xf32>
    %105 = arith.addf %83, %104 : vector<16x32xf32>
    %106 = vector.shape_cast %105 : vector<16x32xf32> to vector<2x8x32xf32>
    %107 = arith.truncf %106 : vector<2x8x32xf32> to vector<2x8x32xbf16>
    %c0_43 = arith.constant 0 : index
    %c0_44 = arith.constant 0 : index
    %c0_45 = arith.constant 0 : index
    %108 = vector.load %arg4[%c0_43, %c0_44, %c0_45] : memref<2x8x32xbf16, #tpu.memory_space<vmem>>, vector<2x8x32xbf16>
    tpu.vector_store %arg4[%c0_43, %c0_44, %c0_45], %107 {strides = array<i32>} : memref<2x8x32xbf16, #tpu.memory_space<vmem>>, vector<2x8x32xbf16>,
    return
  }
  func.func @transform_0(%arg0: i32) -> (i32, i32, i32) {
    %c0_i32 = arith.constant 0 : i32
    %c0_i32_0 = arith.constant 0 : i32
    %c0_i32_1 = arith.constant 0 : i32
    return %arg0, %c0_i32, %c0_i32_0 : i32, i32, i32
  }
  func.func @transform_1(%arg0: i32) -> (i32, i32, i32) {
    %c0_i32 = arith.constant 0 : i32
    %c0_i32_0 = arith.constant 0 : i32
    %c0_i32_1 = arith.constant 0 : i32
    %c0_i32_2 = arith.constant 0 : i32
    return %c0_i32, %c0_i32_0, %c0_i32_1 : i32, i32, i32
  }
  func.func @transform_2(%arg0: i32) -> (i32, i32, i32) {
    %c0_i32 = arith.constant 0 : i32
    %c0_i32_0 = arith.constant 0 : i32
    %c0_i32_1 = arith.constant 0 : i32
    %c0_i32_2 = arith.constant 0 : i32
    return %c0_i32, %c0_i32_0, %c0_i32_1 : i32, i32, i32
  }
  func.func @transform_3(%arg0: i32) -> (i32, i32, i32) {
    %c0_i32 = arith.constant 0 : i32
    %c0_i32_0 = arith.constant 0 : i32
    %c0_i32_1 = arith.constant 0 : i32
    return %arg0, %c0_i32, %c0_i32_0 : i32, i32, i32
  }
}

</mosaic_0001>

<bundles_post_ra>
// kernel: vit_self_attention.1
= control target key start
LH: loop header
LB: loop body
LE: loop exit
PB: predicated region body
PF: predicated region fallthrough
CT: control target
= control target key end

     0   :  { %8 = vsyncpa [#allocation3], 0  ;;  %s1916_s0 = inlined_call_operand.vmem [shape: bf16[2,8,32], index: 0, kind: input, shape index: {}]   ;;  %s1917_s1 = inlined_call_operand.hbm [shape: bf16[3,32,32], index: 1, kind: input, shape index: {}]   ;;  %s1918_s2 = inlined_call_operand.vmem [shape: bf16[4,8,32], index: 2, kind: input, shape index: {}]   ;;  %s1919_s3 = inlined_call_operand.hbm [shape: bf16[2,8,32], index: 3, kind: output, shape index: {}]  }
   0x1   :  { %9 = vsyncpa [#allocation4], 0  ;;  %s1657_s12 = smov [#allocation2]  }
   0x2   :  { %s17_s13 = sshll.u32 %s1657_s12, 4  ;;  %s18_s13 = int_to_ptr.vmem [resolvable:$true] %s17_s13 }
   0x3   :  { %s1621_s14 = scalar_lea.vmem %s18_s13, 768  ;;  %p1626_p1 = scmp.lt.s32.totalorder %s18_s13, %s18_s13 }
   0x4   :  { %p1622_p0 = scmp.ne.s32.totalorder %s18_s13, %s1621_s14  ;;  %p1627_p2 = scmp.lt.s32.totalorder %s1621_s14, %s1621_s14 }
   0x6   :  { %p1628_p3 = por %p1627_p2, %p1626_p1 }
   0x8   :  { %p1629_p4 = pnand %p1628_p3, %p1622_p0 }
   0xa   :  { %1632 = shalt.err (!%p1629_p4)
}
   0xb   :  { %s1658_s15 = smov 64   ;;  %s1659_s16 = smov 4  }
   0xc   :  { %23 = dma.hbm_to_vmem [thread:$0]  %s1917_s1, 768, %s18_s13, [#allocation3], %s1658_s15, %s1658_s15, %s1659_s16  }
   0xd   :  { %1653 = dma.done.wait [#allocation3], 768  }
   0xe   :  { %1654 = vsyncadd [#allocation3], 4294966528  ;;  %v1660_v0 = vmov 0.0   ;;  %vm1661_vm0 = vmmov 0   ;;  %v1574_v1 = vld [vmem:[#allocation2 + $0x18] sm:$0xff]   ;;  %v1575_v2 = vld [vmem:[#allocation2 + $0x8] sm:$0xff]  }
   0xf   :  { %1429 = vmatprep.subr.bf16.mxu1 %v1660_v0  ;;  %1421 = vmatprep.subr.bf16.mxu0 %v1660_v0  ;;  %v1576_v3 = vld [vmem:[#allocation2 + $0x10] sm:$0xff]   ;;  %v1577_v4 = vld [vmem:[#allocation2] sm:$0xff]   ;;  %vm53_vm1 = vcmask 261120   ;;  %v1579_v6 = vld [vmem:[#allocation2 + $0x28] sm:$0xff]   ;;  %vm232_vm2 = vcmask 64512   ;;  %vm348_vm3 = vcmask 1043456  }
  0x10   :  { %1433 = vmatprep.mubr.msk.bf16.mxu1 %vm1661_vm0, %v1660_v0  ;;  %1425 = vmatprep.mubr.msk.bf16.mxu0 %vm1661_vm0, %v1660_v0  ;;  %v1578_v5 = vld [vmem:[%s1916_s0] sm:$0xff]   ;;  %v1580_v7 = vld [vmem:[#allocation2 + $0x20] sm:$0xff]   ;;  %s1662_s0 = smov 120   ;;  %s1663_s20 = smov 112   ;;  %vm1307_vm4 = vcmask 257024  }
  0x11   :  { %1430 = vmatpush3.bf16.msra.mxu1 %v1574_v1  ;;  %1422 = vmatpush3.bf16.msra.mxu0 %v1575_v2  ;;  %s1664_s25 = smov 104  }
  0x12   :  { %1431 = vmatprep.subr.bf16.mxu1 %v1660_v0  ;;  %1423 = vmatprep.subr.bf16.mxu0 %v1660_v0 }
  0x15   :  { %1432 = vmatpush3.bf16.msra.mxu1 %v1576_v3  ;;  %1424 = vmatpush3.bf16.msra.mxu0 %v1577_v4 }
  0x16   :  { %1445 = vmatprep.subr.bf16.mxu1 %v1660_v0  ;;  %1437 = vmatprep.subr.bf16.mxu0 %v1660_v0 }
  0x18   :  { %1434 = vmatmul.mubr.msk.bf16.vlgmr.msra.gmra.mxu1 %vm53_vm1, %v1578_v5  ;;  %1426 = vmatmul.mubr.msk.bf16.vlgmr.msra.gmra.mxu0 %vm53_vm1, %v1578_v5 }
  0x19   :  { %1447 = vmatprep.mubr.msk.bf16.mxu1 %vm1661_vm0, %v1660_v0  ;;  %1438 = vmatpush3.bf16.msra.mxu0 %v1579_v6 }
  0x1a   :  { %1441 = vmatprep.mubr.msk.bf16.mxu0 %vm1661_vm0, %v1660_v0  ;;  %1439 = vmatprep.subr.bf16.mxu0 %v1660_v0 }
  0x1d   :  { %1440 = vmatpush3.bf16.msra.mxu0 %v1580_v7 }
  0x1e   :  { %1451 = vmatprep.subr.bf16.mxu0 %v1660_v0 }
  0x20   :  { %1442 = vmatmul.mubr.msk.bf16.vlgmr.msra.gmra.mxu0 %vm53_vm1, %v1578_v5 }
  0x21   :  { %1453 = vmatprep.mubr.msk.bf16.mxu0 %vm1661_vm0, %v1660_v0 }
  0xd8   :  { %v150_v8 = vpop.f32.mrf.mxu1  ;;  %v91_v10 = vpop.f32.mrf.mxu0 }
  0xd9   :  { %v1713_v9 = vpack.c.bf16 %v150_v8, %v150_v8  ;;  %v1722_v18 = vpack.c.bf16 %v91_v10, %v91_v10 }
  0xda   :  { %v1435_v11 = vpop.f32.mrf.mxu1  ;;  %v1427_v13 = vpop.f32.mrf.mxu0 }
  0xdb   :  { %446 = vrot.lane.b32.xlu1 %v1713_v9, %s1662_s0  ;;  %v237_v12 = vsel %vm232_vm2, %v1713_v9, 0 }
  0xdc   :  { %v153_v14 = vpop.f32.mrf.mxu1  ;;  %1446 = vmatpush3.bf16.xpose.msra.mxu1 %v237_v12  ;;  %v94_v16 = vpop.f32.mrf.mxu0 }
  0xdd   :  { %v1719_v15 = vpack.c.bf16 %v153_v14, %v153_v14  ;;  %1457 = vmatprep.subr.bf16.mxu1 %v1660_v0  ;;  %v1726_v19 = vpack.c.bf16 %v94_v16, %v94_v16 }
  0xde   :  { %v1436_v17 = vpop.f32.mrf.mxu1  ;;  %v1428_v21 = vpop.f32.mrf.mxu0 }
  0xdf   :  { %496 = vrot.lane.b32.xlu1 %v1719_v15, %s1662_s0  ;;  %v283_v20 = vsel %vm232_vm2, %v1719_v15, 0 }
  0xe0   :  { %1452 = vmatpush3.bf16.xpose.msra.mxu0 %v283_v20  ;;  %v209_v22 = vpop.f32.mrf.mxu0 }
  0xe1   :  { %1463 = vmatprep.subr.bf16.mxu0 %v1660_v0  ;;  %v1741_v26 = vpack.c.bf16 %v209_v22, %v209_v22 }
  0xe2   :  { %v1443_v23 = vpop.f32.mrf.mxu0 }
  0xe3   :  { %1448 = vmatmul.mubr.msk.bf16.vlgmr.msra.gmra.mxu1 %vm232_vm2, %v1722_v18  ;;  %494 = vrot.lane.b32.xlu1 %v1726_v19, %s1662_s0  ;;  %v350_v28 = vsel %vm348_vm3, %v1741_v26, 0 }
  0xe4   :  { %1459 = vmatprep.mubr.msk.bf16.mxu1 %vm1661_vm0, %v1660_v0  ;;  %v212_v24 = vpop.f32.mrf.mxu0  ;;  %1458 = vmatpush3.bf16.msra.mxu1 %v350_v28 }
  0xe5   :  { %v1743_v27 = vpack.c.bf16 %v212_v24, %v212_v24  ;;  %1469 = vmatprep.subr.bf16.mxu1 %v1660_v0 }
  0xe6   :  { %v1444_v25 = vpop.f32.mrf.mxu0 }
  0xe7   :  { %1454 = vmatmul.mubr.msk.bf16.vlgmr.msra.gmra.mxu0 %vm232_vm2, %v1726_v19  ;;  %v396_v29 = vsel %vm348_vm3, %v1743_v27, 0 }
  0xe8   :  { %1465 = vmatprep.mubr.msk.bf16.mxu0 %vm1661_vm0, %v1660_v0  ;;  %1464 = vmatpush3.bf16.msra.mxu0 %v396_v29 }
  0xe9   :  { %1475 = vmatprep.subr.bf16.mxu0 %v1660_v0 }
 0x14d   :  { %v447_v46 = vpop.permute.xlu1 %446 }
 0x14e   :  { %v452_v49 = vsel %vm232_vm2, %v447_v46, 0  ;;  %v1351_v46 = vld [vmem:[%s1918_s2 + $0x4] sm:$0xf] }
 0x151   :  { %v497_v51 = vpop.permute.xlu1 %496 }
 0x152   :  { %v502_v53 = vsel %vm232_vm2, %v497_v51, 0 }
 0x155   :  { %v495_v55 = vpop.permute.xlu1 %494 }
 0x1a3   :  { %v273_v30 = vpop.f32.mrf.mxu1 }
 0x1a4   :  { %v325_v31 = vsel %vm232_vm2, %v273_v30, -inf }
 0x1a5   :  { %326 = vmax.xlane.f32.xlu0 %v325_v31  ;;  %v1449_v32 = vpop.f32.mrf.mxu1 }
 0x1a6   :  { %v443_v32 = vld [vmem:[%s1918_s2] sm:$0xf] }
 0x1a7   :  { %v276_v33 = vpop.f32.mrf.mxu1  ;;  %v319_v34 = vpop.f32.mrf.mxu0 }
 0x1a8   :  { %v328_v35 = vsel %vm232_vm2, %v319_v34, -inf }
 0x1a9   :  { %v1450_v36 = vpop.f32.mrf.mxu1  ;;  %329 = vmax.xlane.f32.xlu0 %v328_v35  ;;  %v1455_v37 = vpop.f32.mrf.mxu0 }
 0x1aa   :  { %v718_v36 = vsel %vm348_vm3, %v443_v32, 0 }
 0x1ab   :  { %v322_v38 = vpop.f32.mrf.mxu0 }
 0x1ad   :  { %v1456_v39 = vpop.f32.mrf.mxu0 }
 0x1bf   :  { %444 = vrot.lane.b32.xlu0 %v1722_v18, %s1662_s0 }
 0x22e   :  { %v327_v40 = vpop.xlane.xlu0 %326 }
 0x22f   :  { %v331_v41 = vsub.f32 %v273_v30, %v327_v40 }
 0x231   :  { %v333_v42 = vmul.f32 1.442695, %v331_v41 }
 0x232   :  { %v330_v43 = vpop.xlane.xlu0 %329 }
 0x233   :  { %1581 = vpow2.f32 %v333_v42  ;;  %v332_v44 = vsub.f32 %v319_v34, %v330_v43 }
 0x235   :  { %v335_v45 = vmul.f32 1.442695, %v332_v44 }
 0x236   :  { %v445_v54 = vpop.permute.xlu0 %444 }
 0x237   :  { %1583 = vpow2.f32 %v335_v45 }
 0x240   :  { %v1582_v47 = vpop.eup %1581 }
 0x241   :  { %v343_v48 = vpack.c.bf16 %v1582_v47, %v1582_v47  ;;  %v337_v12 = vsel %vm232_vm2, %v1582_v47, 0.0  ;;  %v671_v47 = vsel %vm348_vm3, %v1351_v46, 0 }
 0x243   :  { %1460 = vmatmul.mubr.msk.bf16.vlgmr.msra.gmra.mxu1 %vm232_vm2, %v343_v48 }
 0x244   :  { %v1584_v50 = vpop.eup %1583  ;;  %1470 = vmatpush3.bf16.xpose.msra.mxu1 %v452_v49  ;;  %1471 = vmatprep.mubr.msk.bf16.mxu1 %vm1661_vm0, %v1660_v0 }
 0x245   :  { %v344_v52 = vpack.c.bf16 %v1584_v50, %v1584_v50  ;;  %1481 = vmatprep.subr.bf16.mxu1 %v1660_v0  ;;  %v340_v13 = vsel %vm232_vm2, %v1584_v50, 0.0 }
 0x247   :  { %1466 = vmatmul.mubr.msk.bf16.vlgmr.msra.gmra.mxu0 %vm232_vm2, %v344_v52 }
 0x248   :  { %1476 = vmatpush3.bf16.xpose.msra.mxu0 %v502_v53  ;;  %1477 = vmatprep.mubr.msk.bf16.mxu0 %vm1661_vm0, %v1660_v0 }
 0x249   :  { %1487 = vmatprep.subr.bf16.mxu0 %v1660_v0 }
 0x24b   :  { %1472 = vmatmul.mubr.msk.bf16.vlgmr.msra.gmra.mxu1 %vm232_vm2, %v445_v54 }
 0x24c   :  { %1483 = vmatprep.mubr.msk.bf16.mxu1 %vm1661_vm0, %v1660_v0 }
 0x24f   :  { %1478 = vmatmul.mubr.msk.bf16.vlgmr.msra.gmra.mxu0 %vm232_vm2, %v495_v55 }
 0x250   :  { %1489 = vmatprep.mubr.msk.bf16.mxu0 %vm1661_vm0, %v1660_v0 }
 0x303   :  { %v1771_v56 = vpop.f32.mrf.mxu1 }
 0x305   :  { %v1461_v57 = vpop.f32.mrf.mxu1 }
 0x307   :  { %v389_v58 = vpop.f32.mrf.mxu1  ;;  %v1773_v59 = vpop.f32.mrf.mxu0 }
 0x309   :  { %v1462_v60 = vpop.f32.mrf.mxu1  ;;  %v1467_v61 = vpop.f32.mrf.mxu0 }
 0x30b   :  { %v435_v62 = vpop.f32.mrf.mxu0  ;;  %v488_v63 = vpop.f32.mrf.mxu1 }
 0x30c   :  { %v544_v1 = vsel %vm232_vm2, %v488_v63, -inf }
 0x30d   :  { %545 = vmax.xlane.f32.xlu1 %v544_v1  ;;  %v1468_v2 = vpop.f32.mrf.mxu0  ;;  %v1473_v3 = vpop.f32.mrf.mxu1 }
 0x30f   :  { %v491_v4 = vpop.f32.mrf.mxu1  ;;  %v538_v5 = vpop.f32.mrf.mxu0 }
 0x310   :  { %v547_v6 = vsel %vm232_vm2, %v538_v5, -inf }
 0x311   :  { %v1474_v7 = vpop.f32.mrf.mxu1  ;;  %548 = vmax.xlane.f32.xlu0 %v547_v6  ;;  %v1479_v8 = vpop.f32.mrf.mxu0 }
 0x313   :  { %v541_v10 = vpop.f32.mrf.mxu0 }
 0x315   :  { %v1480_v11 = vpop.f32.mrf.mxu0 }
 0x31e   :  { %564 = vrot.lane.b32.xlu1 %v1741_v26, %s1662_s0 }
 0x327   :  { %612 = vrot.lane.b32.xlu0 %v1743_v27, %s1662_s0 }
 0x342   :  { %338 = vadd.xlane.f32.xlu1 %v337_v12 }
 0x346   :  { %341 = vadd.xlane.f32.xlu0 %v340_v13 }
 0x353   :  { %763 = vrot.lane.b32.xlu1 %v1713_v9, %s1663_s20 }
 0x35c   :  { %813 = vrot.lane.b32.xlu0 %v1719_v15, %s1663_s20 }
 0x396   :  { %v546_v14 = vpop.xlane.xlu1 %545 }
 0x397   :  { %v550_v16 = vsub.f32 %v488_v63, %v546_v14 }
 0x399   :  { %v552_v17 = vmul.f32 1.442695, %v550_v16 }
 0x39a   :  { %v565_v20 = vpop.permute.xlu1 %564  ;;  %v549_v21 = vpop.xlane.xlu0 %548 }
 0x39b   :  { %1585 = vpow2.f32 %v552_v17  ;;  %v570_v22 = vsel %vm348_vm3, %v565_v20, 0  ;;  %v551_v23 = vsub.f32 %v538_v5, %v549_v21 }
 0x39c   :  { %1482 = vmatpush3.bf16.msra.mxu1 %v570_v22 }
 0x39d   :  { %v554_v24 = vmul.f32 1.442695, %v551_v23  ;;  %1493 = vmatprep.subr.bf16.mxu1 %v1660_v0 }
 0x39e   :  { %v613_v25 = vpop.permute.xlu0 %612 }
 0x39f   :  { %1587 = vpow2.f32 %v554_v24  ;;  %v618_v28 = vsel %vm348_vm3, %v613_v25, 0 }
 0x3a0   :  { %1488 = vmatpush3.bf16.msra.mxu0 %v618_v28 }
 0x3a1   :  { %1499 = vmatprep.subr.bf16.mxu0 %v1660_v0 }
 0x3a8   :  { %v1586_v29 = vpop.eup %1585 }
 0x3a9   :  { %v556_v30 = vsel %vm232_vm2, %v1586_v29, 0.0  ;;  %v562_v31 = vpack.c.bf16 %v1586_v29, %v1586_v29 }
 0x3aa   :  { %557 = vadd.xlane.f32.xlu1 %v556_v30 }
 0x3ab   :  { %1484 = vmatmul.mubr.msk.bf16.vlgmr.msra.gmra.mxu1 %vm232_vm2, %v562_v31 }
 0x3ac   :  { %v1588_v33 = vpop.eup %1587  ;;  %1495 = vmatprep.mubr.msk.bf16.mxu1 %vm1661_vm0, %v1660_v0  ;;  %1494 = vmatpush3.bf16.msra.mxu1 %v671_v47 }
 0x3ad   :  { %v559_v34 = vsel %vm232_vm2, %v1588_v33, 0.0  ;;  %v563_v35 = vpack.c.bf16 %v1588_v33, %v1588_v33  ;;  %1505 = vmatprep.subr.bf16.mxu1 %v1660_v0 }
 0x3ae   :  { %560 = vadd.xlane.f32.xlu1 %v559_v34 }
 0x3af   :  { %1490 = vmatmul.mubr.msk.bf16.vlgmr.msra.gmra.mxu0 %vm232_vm2, %v563_v35 }
 0x3b0   :  { %1500 = vmatpush3.bf16.msra.mxu0 %v718_v36  ;;  %1501 = vmatprep.mubr.msk.bf16.mxu0 %vm1661_vm0, %v1660_v0 }
 0x3b1   :  { %1511 = vmatprep.subr.bf16.mxu0 %v1660_v0 }
 0x3bf   :  { %761 = vrot.lane.b32.xlu1 %v1722_v18, %s1663_s20 }
 0x3c3   :  { %811 = vrot.lane.b32.xlu1 %v1726_v19, %s1663_s20 }
 0x3cb   :  { %v339_v37 = vpop.xlane.xlu1 %338 }
 0x3cc   :  { %1589 = vrcp.f32 %v339_v37 }
 0x3cf   :  { %v342_v38 = vpop.xlane.xlu0 %341  ;;  %v764_v48 = vpop.permute.xlu1 %763 }
 0x3d0   :  { %1591 = vrcp.f32 %v342_v38  ;;  %v769_v2 = vsel %vm232_vm2, %v764_v48, 0 }
 0x3d3   :  { %v814_v43 = vpop.permute.xlu0 %813 }
 0x3d4   :  { %v819_v45 = vsel %vm232_vm2, %v814_v43, 0 }
 0x3d9   :  { %v1590_v39 = vpop.eup %1589 }
 0x3da   :  { %v440_v41 = vmul.f32 %v1590_v39, %v1771_v56 }
 0x3dd   :  { %v1592_v40 = vpop.eup %1591 }
 0x3de   :  { %v441_v42 = vmul.f32 %v1592_v40, %v1773_v59 }
 0x3e0   :  { %v442_v44 = vpack.c.bf16 %v441_v42, %v440_v41  ;;  %v1358_v42 = vld [vmem:[%s1918_s2 + $0x8] sm:$0xf] }
 0x3e1   :  { %v988_v43 = vsel %vm348_vm3, %v1358_v42, 0 }
 0x3e2   :  { %1502 = vmatmul.mubr.msk.bf16.vlgmr.msra.gmra.mxu0 %vm232_vm2, %v442_v44 }
 0x3e3   :  { %1512 = vmatpush3.bf16.xpose.msra.mxu0 %v819_v45  ;;  %1513 = vmatprep.mubr.msk.bf16.mxu0 %vm1661_vm0, %v1660_v0 }
 0x3e4   :  { %1523 = vmatprep.subr.bf16.mxu0 %v1660_v0 }
 0x433   :  { %v558_v49 = vpop.xlane.xlu1 %557 }
 0x434   :  { %1593 = vrcp.f32 %v558_v49 }
 0x437   :  { %v561_v50 = vpop.xlane.xlu1 %560 }
 0x438   :  { %1595 = vrcp.f32 %v561_v50 }
 0x43b   :  { %v762_v51 = vpop.permute.xlu1 %761 }
 0x43f   :  { %v812_v52 = vpop.permute.xlu1 %811 }
 0x440   :  { %1514 = vmatmul.mubr.msk.bf16.vlgmr.msra.gmra.mxu0 %vm232_vm2, %v812_v52 }
 0x441   :  { %1525 = vmatprep.mubr.msk.bf16.mxu0 %vm1661_vm0, %v1660_v0  ;;  %v1594_v55 = vpop.eup %1593 }
 0x445   :  { %v1596_v56 = vpop.eup %1595 }
 0x46b   :  { %v606_v53 = vpop.f32.mrf.mxu1 }
 0x46c   :  { %v662_v59 = vmul.f32 %v1594_v55, %v606_v53 }
 0x46d   :  { %v1485_v54 = vpop.f32.mrf.mxu1 }
 0x46f   :  { %v609_v57 = vpop.f32.mrf.mxu1  ;;  %v654_v58 = vpop.f32.mrf.mxu0 }
 0x470   :  { %v663_v60 = vmul.f32 %v1596_v56, %v654_v58 }
 0x471   :  { %v1486_v61 = vpop.f32.mrf.mxu1  ;;  %v1491_v62 = vpop.f32.mrf.mxu0 }
 0x472   :  { %v664_v63 = vpack.c.bf16 %v663_v60, %v662_v59 }
 0x473   :  { %v657_v1 = vpop.f32.mrf.mxu0 }
 0x474   :  { %1496 = vmatmul.mubr.msk.bf16.vlgmr.msra.gmra.mxu1 %vm232_vm2, %v664_v63 }
 0x475   :  { %1506 = vmatpush3.bf16.xpose.msra.mxu1 %v769_v2  ;;  %v1492_v3 = vpop.f32.mrf.mxu0  ;;  %1507 = vmatprep.mubr.msk.bf16.mxu1 %vm1661_vm0, %v1660_v0 }
 0x476   :  { %1517 = vmatprep.subr.bf16.mxu1 %v1660_v0 }
 0x47c   :  { %1508 = vmatmul.mubr.msk.bf16.vlgmr.msra.gmra.mxu1 %vm232_vm2, %v762_v51 }
 0x47d   :  { %1519 = vmatprep.mubr.msk.bf16.mxu1 %vm1661_vm0, %v1660_v0 }
 0x4a2   :  { %v1831_v4 = vpop.f32.mrf.mxu0 }
 0x4a4   :  { %v1503_v5 = vpop.f32.mrf.mxu0 }
 0x4a6   :  { %v1833_v6 = vpop.f32.mrf.mxu0 }
 0x4a8   :  { %v1504_v7 = vpop.f32.mrf.mxu0 }
 0x500   :  { %v855_v8 = vpop.f32.mrf.mxu0 }
 0x501   :  { %v864_v10 = vsel %vm232_vm2, %v855_v8, -inf }
 0x502   :  { %865 = vmax.xlane.f32.xlu0 %v864_v10  ;;  %v1515_v11 = vpop.f32.mrf.mxu0 }
 0x504   :  { %v858_v12 = vpop.f32.mrf.mxu0 }
 0x506   :  { %v1516_v13 = vpop.f32.mrf.mxu0 }
 0x518   :  { %881 = vrot.lane.b32.xlu0 %v1741_v26, %s1663_s20 }
 0x534   :  { %v1838_v14 = vpop.f32.mrf.mxu1 }
 0x535   :  { %v755_v7 = vadd.f32 %v1831_v4, %v1838_v14 }
 0x536   :  { %v1497_v16 = vpop.f32.mrf.mxu1 }
 0x538   :  { %v1840_v17 = vpop.f32.mrf.mxu1 }
 0x539   :  { %v758_v12 = vadd.f32 %v1833_v6, %v1840_v17 }
 0x53a   :  { %v1498_v20 = vpop.f32.mrf.mxu1 }
 0x53c   :  { %v805_v21 = vpop.f32.mrf.mxu1 }
 0x53d   :  { %v861_v22 = vsel %vm232_vm2, %v805_v21, -inf }
 0x53e   :  { %862 = vmax.xlane.f32.xlu1 %v861_v22  ;;  %v1509_v23 = vpop.f32.mrf.mxu1 }
 0x540   :  { %v808_v24 = vpop.f32.mrf.mxu1 }
 0x542   :  { %v1510_v25 = vpop.f32.mrf.mxu1 }
 0x54f   :  { %929 = vrot.lane.b32.xlu1 %v1743_v27, %s1663_s20 }
 0x58b   :  { %v866_v28 = vpop.xlane.xlu0 %865 }
 0x58c   :  { %v868_v29 = vsub.f32 %v855_v8, %v866_v28 }
 0x58e   :  { %v871_v30 = vmul.f32 1.442695, %v868_v29 }
 0x58f   :  { %v882_v31 = vpop.permute.xlu0 %881 }
 0x590   :  { %1597 = vpow2.f32 %v871_v30  ;;  %v887_v32 = vsel %vm348_vm3, %v882_v31, 0 }
 0x591   :  { %1518 = vmatpush3.bf16.msra.mxu1 %v887_v32 }
 0x592   :  { %1529 = vmatprep.subr.bf16.mxu1 %v1660_v0 }
 0x59d   :  { %v1598_v33 = vpop.eup %1597 }
 0x59e   :  { %v876_v34 = vsel %vm232_vm2, %v1598_v33, 0.0  ;;  %v880_v40 = vpack.c.bf16 %v1598_v33, %v1598_v33 }
 0x59f   :  { %877 = vadd.xlane.f32.xlu0 %v876_v34 }
 0x5b5   :  { %1035 = vrot.lane.b32.xlu0 %v1713_v9, %s1664_s25 }
 0x5b9   :  { %1083 = vrot.lane.b32.xlu0 %v1726_v19, %s1664_s25 }
 0x5c7   :  { %v863_v35 = vpop.xlane.xlu1 %862 }
 0x5c8   :  { %v867_v36 = vsub.f32 %v805_v21, %v863_v35 }
 0x5ca   :  { %v869_v37 = vmul.f32 1.442695, %v867_v36 }
 0x5cb   :  { %v930_v38 = vpop.permute.xlu1 %929 }
 0x5cc   :  { %1599 = vpow2.f32 %v869_v37  ;;  %v935_v39 = vsel %vm348_vm3, %v930_v38, 0  ;;  %v1364_v38 = vld [vmem:[%s1918_s2 + $0xc] sm:$0xf]  ;;  %s1665_s2 = smov [#allocation5]  }
 0x5cd   :  { %1524 = vmatpush3.bf16.msra.mxu0 %v935_v39  ;;  %v1260_v39 = vsel %vm348_vm3, %v1364_v38, 0  ;;  %s1315_s30 = sshll.u32 %s1665_s2, 4  ;;  %s1316_s30 = int_to_ptr.vmem [resolvable:$true] %s1315_s30 }
 0x5ce   :  { %1535 = vmatprep.subr.bf16.mxu0 %v1660_v0  ;;  %s1633_s4 = scalar_lea.vmem %s1316_s30, 128  ;;  %p1638_p6 = scmp.lt.s32.totalorder %s1316_s30, %s1316_s30 }
 0x5cf   :  { %p1634_p5 = scmp.ne.s32.totalorder %s1316_s30, %s1633_s4  ;;  %p1639_p7 = scmp.lt.s32.totalorder %s1633_s4, %s1633_s4 }
 0x5d0   :  { %1526 = vmatmul.mubr.msk.bf16.vlgmr.msra.gmra.mxu0 %vm232_vm2, %v880_v40 }
 0x5d1   :  { %1537 = vmatprep.mubr.msk.bf16.mxu0 %vm1661_vm0, %v1660_v0  ;;  %p1640_p8 = por %p1639_p7, %p1638_p6 }
 0x5d3   :  { %p1641_p9 = pnand %p1640_p8, %p1634_p5 }
 0x5d9   :  { %v1600_v9 = vpop.eup %1599 }
 0x5da   :  { %v873_v41 = vsel %vm232_vm2, %v1600_v9, 0.0  ;;  %v879_v19 = vpack.c.bf16 %v1600_v9, %v1600_v9 }
 0x5db   :  { %874 = vadd.xlane.f32.xlu1 %v873_v41 }
 0x5dc   :  { %1520 = vmatmul.mubr.msk.bf16.vlgmr.msra.gmra.mxu1 %vm232_vm2, %v879_v19 }
 0x5dd   :  { %1531 = vmatprep.mubr.msk.bf16.mxu1 %vm1661_vm0, %v1660_v0  ;;  %1530 = vmatpush3.bf16.msra.mxu1 %v988_v43 }
 0x5de   :  { %1541 = vmatprep.subr.bf16.mxu1 %v1660_v0 }
 0x5ec   :  { %1085 = vrot.lane.b32.xlu1 %v1719_v15, %s1664_s25 }
 0x5f0   :  { %1033 = vrot.lane.b32.xlu1 %v1722_v18, %s1664_s25 }
 0x628   :  { %v878_v44 = vpop.xlane.xlu0 %877 }
 0x629   :  { %1601 = vrcp.f32 %v878_v44 }
 0x62c   :  { %v1036_v45 = vpop.permute.xlu0 %1035 }
 0x62d   :  { %v1041_v46 = vsel %vm232_vm2, %v1036_v45, 0 }
 0x62e   :  { %1536 = vmatpush3.bf16.xpose.msra.mxu0 %v1041_v46 }
 0x62f   :  { %1547 = vmatprep.subr.bf16.mxu0 %v1660_v0 }
 0x630   :  { %v1084_v62 = vpop.permute.xlu0 %1083 }
 0x636   :  { %v1602_v52 = vpop.eup %1601 }
 0x664   :  { %v875_v15 = vpop.xlane.xlu1 %874 }
 0x665   :  { %1603 = vrcp.f32 %v875_v15 }
 0x668   :  { %v1086_v47 = vpop.permute.xlu1 %1085 }
 0x669   :  { %v1091_v60 = vsel %vm232_vm2, %v1086_v47, 0 }
 0x66c   :  { %v1034_v48 = vpop.permute.xlu1 %1033 }
 0x66d   :  { %1538 = vmatmul.mubr.msk.bf16.vlgmr.msra.gmra.mxu0 %vm232_vm2, %v1034_v48 }
 0x66e   :  { %1549 = vmatprep.mubr.msk.bf16.mxu0 %vm1661_vm0, %v1660_v0 }
 0x672   :  { %v1604_v53 = vpop.eup %1603 }
 0x690   :  { %v971_v18 = vpop.f32.mrf.mxu0 }
 0x691   :  { %v980_v55 = vmul.f32 %v1602_v52, %v971_v18 }
 0x692   :  { %v1527_v49 = vpop.f32.mrf.mxu0 }
 0x694   :  { %v974_v50 = vpop.f32.mrf.mxu0 }
 0x696   :  { %v1528_v51 = vpop.f32.mrf.mxu0 }
 0x69c   :  { %v923_v54 = vpop.f32.mrf.mxu1 }
 0x69d   :  { %v979_v56 = vmul.f32 %v1604_v53, %v923_v54 }
 0x69e   :  { %v1521_v57 = vpop.f32.mrf.mxu1 }
 0x69f   :  { %v981_v58 = vpack.c.bf16 %v980_v55, %v979_v56 }
 0x6a0   :  { %v926_v59 = vpop.f32.mrf.mxu1 }
 0x6a1   :  { %1532 = vmatmul.mubr.msk.bf16.vlgmr.msra.gmra.mxu1 %vm232_vm2, %v981_v58 }
 0x6a2   :  { %1542 = vmatpush3.bf16.xpose.msra.mxu1 %v1091_v60  ;;  %v1522_v61 = vpop.f32.mrf.mxu1  ;;  %1543 = vmatprep.mubr.msk.bf16.mxu1 %vm1661_vm0, %v1660_v0 }
 0x6a3   :  { %1553 = vmatprep.subr.bf16.mxu1 %v1660_v0 }
 0x6a9   :  { %1544 = vmatmul.mubr.msk.bf16.vlgmr.msra.gmra.mxu1 %vm232_vm2, %v1084_v62 }
 0x6aa   :  { %1555 = vmatprep.mubr.msk.bf16.mxu1 %vm1661_vm0, %v1660_v0 }
 0x72d   :  { %v1077_v63 = vpop.f32.mrf.mxu0 }
 0x72e   :  { %v1133_v1 = vsel %vm232_vm2, %v1077_v63, -inf }
 0x72f   :  { %1134 = vmax.xlane.f32.xlu1 %v1133_v1  ;;  %v1539_v2 = vpop.f32.mrf.mxu0 }
 0x731   :  { %v1080_v3 = vpop.f32.mrf.mxu0 }
 0x733   :  { %v1540_v5 = vpop.f32.mrf.mxu0 }
 0x740   :  { %1201 = vrot.lane.b32.xlu1 %v1743_v27, %s1664_s25 }
 0x761   :  { %v1024_v8 = vpop.f32.mrf.mxu1 }
 0x762   :  { %v1031_v10 = vadd.f32 %v1024_v8, %v755_v7 }
 0x763   :  { %v1533_v11 = vpop.f32.mrf.mxu1 }
 0x765   :  { %v1027_v13 = vpop.f32.mrf.mxu1 }
 0x766   :  { %v1890_v16 = vadd.f32 %v1027_v13, %v758_v12 }
 0x767   :  { %v1534_v20 = vpop.f32.mrf.mxu1 }
 0x769   :  { %v1127_v21 = vpop.f32.mrf.mxu1 }
 0x76a   :  { %v1136_v22 = vsel %vm232_vm2, %v1127_v21, -inf }
 0x76b   :  { %1137 = vmax.xlane.f32.xlu0 %v1136_v22  ;;  %v1545_v23 = vpop.f32.mrf.mxu1 }
 0x76d   :  { %v1130_v24 = vpop.f32.mrf.mxu1 }
 0x76f   :  { %v1546_v27 = vpop.f32.mrf.mxu1 }
 0x781   :  { %1153 = vrot.lane.b32.xlu0 %v1741_v26, %s1664_s25 }
 0x7b8   :  { %v1135_v4 = vpop.xlane.xlu1 %1134 }
 0x7b9   :  { %v1139_v14 = vsub.f32 %v1077_v63, %v1135_v4 }
 0x7bb   :  { %v1141_v25 = vmul.f32 1.442695, %v1139_v14 }
 0x7bc   :  { %v1202_v28 = vpop.permute.xlu1 %1201 }
 0x7bd   :  { %1605 = vpow2.f32 %v1141_v25  ;;  %v1207_v6 = vsel %vm348_vm3, %v1202_v28, 0 }
 0x7be   :  { %1554 = vmatpush3.bf16.msra.mxu1 %v1207_v6 }
 0x7ca   :  { %v1606_v17 = vpop.eup %1605 }
 0x7cb   :  { %v1145_v29 = vsel %vm232_vm2, %v1606_v17, 0.0  ;;  %v1151_v26 = vpack.c.bf16 %v1606_v17, %v1606_v17 }
 0x7cc   :  { %1146 = vadd.xlane.f32.xlu1 %v1145_v29 }
 0x7f4   :  { %v1138_v30 = vpop.xlane.xlu0 %1137 }
 0x7f5   :  { %v1140_v31 = vsub.f32 %v1127_v21, %v1138_v30 }
 0x7f7   :  { %v1143_v32 = vmul.f32 1.442695, %v1140_v31 }
 0x7f8   :  { %v1154_v33 = vpop.permute.xlu0 %1153 }
 0x7f9   :  { %1607 = vpow2.f32 %v1143_v32  ;;  %v1159_v34 = vsel %vm348_vm3, %v1154_v33, 0 }
 0x7fa   :  { %1548 = vmatpush3.bf16.msra.mxu0 %v1159_v34 }
 0x7fb   :  { %1559 = vmatprep.subr.bf16.mxu0 %v1660_v0 }
 0x7fd   :  { %1550 = vmatmul.mubr.msk.bf16.vlgmr.msra.gmra.mxu0 %vm232_vm2, %v1151_v26 }
 0x7fe   :  { %1561 = vmatprep.mubr.msk.bf16.mxu0 %vm1661_vm0, %v1660_v0  ;;  %1560 = vmatpush3.bf16.msra.mxu0 %v1260_v39 }
 0x806   :  { %v1608_v35 = vpop.eup %1607 }
 0x807   :  { %v1148_v36 = vsel %vm232_vm2, %v1608_v35, 0.0  ;;  %v1152_v37 = vpack.c.bf16 %v1608_v35, %v1608_v35 }
 0x808   :  { %1149 = vadd.xlane.f32.xlu0 %v1148_v36 }
 0x809   :  { %1556 = vmatmul.mubr.msk.bf16.vlgmr.msra.gmra.mxu1 %vm232_vm2, %v1152_v37 }
 0x855   :  { %v1147_v40 = vpop.xlane.xlu1 %1146 }
 0x856   :  { %1609 = vrcp.f32 %v1147_v40 }
 0x863   :  { %v1610_v43 = vpop.eup %1609 }
 0x891   :  { %v1150_v9 = vpop.xlane.xlu0 %1149 }
 0x892   :  { %1611 = vrcp.f32 %v1150_v9 }
 0x89f   :  { %v1612_v44 = vpop.eup %1611 }
 0x8bd   :  { %v1195_v41 = vpop.f32.mrf.mxu0 }
 0x8be   :  { %v1251_v46 = vmul.f32 %v1610_v43, %v1195_v41 }
 0x8bf   :  { %v1551_v0 = vpop.f32.mrf.mxu0 }
 0x8c1   :  { %v1198_v19 = vpop.f32.mrf.mxu0 }
 0x8c3   :  { %v1552_v42 = vpop.f32.mrf.mxu0 }
 0x8c9   :  { %v1243_v45 = vpop.f32.mrf.mxu1 }
 0x8ca   :  { %v1252_v15 = vmul.f32 %v1612_v44, %v1243_v45 }
 0x8cb   :  { %v1557_v47 = vpop.f32.mrf.mxu1 }
 0x8cc   :  { %v1253_v48 = vpack.c.bf16 %v1252_v15, %v1251_v46 }
 0x8cd   :  { %v1246_v18 = vpop.f32.mrf.mxu1 }
 0x8ce   :  { %1562 = vmatmul.mubr.msk.bf16.vlgmr.msra.gmra.mxu0 %vm232_vm2, %v1253_v48 }
 0x8cf   :  { %v1558_v49 = vpop.f32.mrf.mxu1 }
 0x98e   :  { %v1296_v50 = vpop.f32.mrf.mxu0 }
 0x98f   :  { %v1303_v51 = vadd.f32 %v1296_v50, %v1031_v10 }
 0x990   :  { %v1563_v52 = vpop.f32.mrf.mxu0 }
 0x991   :  { %v1305_v53 = vpack.c.bf16 %v1303_v51, %v1303_v51 }
 0x992   :  { %v1299_v54 = vpop.f32.mrf.mxu0 }
 0x993   :  { %v1304_v55 = vadd.f32 %v1299_v54, %v1890_v16  ;;  %1308 = vst.msk [vmem:[#allocation5] sm:$0xf] %vm1307_vm4, %v1305_v53 }
 0x994   :  { %v1564_v56 = vpop.f32.mrf.mxu0 }
 0x995   :  { %v1306_v57 = vpack.c.bf16 %v1304_v55, %v1304_v55 }
 0x997   :  { %1309 = vst.msk [vmem:[#allocation5 + $0x4] sm:$0xf] %vm1307_vm4, %v1306_v57 }
 0x998   :  { %1644 = shalt.err (!%p1641_p9)
}
 0x999   :  { %1321 = dma.vmem_to_hbm [thread:$0]  %s1316_s30, 128, %s1919_s3, [#allocation4], %s1658_s15, %s1658_s15, %s1659_s16  }
 0x99a   :  { %1655 = dma.done.wait [#allocation4], 128  }
 0x99b   :  { %1656 = vsyncadd [#allocation4], 4294967168 }
 0x99c   :  { %1325 = vsyncpa [#allocation3], 1 }
 0x99d   :  { %1326 = vsyncpa [#allocation4], 1 }

</bundles_post_ra>
